<compile_context>
chip_gen: v7x
topology: tpu7x:2x2x1
jax: 0.10.0
libtpu: 0.0.40
codegen_flags: <defaults>
</compile_context>

<pallas_src>
import math
import functools

import numpy as np
import jax
import jax.numpy as jnp
from jax.experimental import pallas as pl
from jax.experimental.pallas import tpu as pltpu


# ------------------------ generation-aware budgets -------------------------

def _vmem_capacity_bytes():
    try:
        return int(pltpu.get_tpu_info().vmem_capacity_bytes)
    except Exception:
        # Conservative fallback (v7x-sized) so the scoped limit is always legal.
        return 64 * 1024 * 1024


_VMEM_CAP = _vmem_capacity_bytes()
_SMALL_VMEM = _VMEM_CAP <= 64 * 1024 * 1024          # v7x-class TensorCore
# Leave headroom below physical capacity for the compiler's own scratch.
_VMEM_LIMIT = int(min(_VMEM_CAP * 3 // 4, 96 * 1024 * 1024))

_DEF_TILE_M = 256 if _SMALL_VMEM else 512
_DEF_TILE_N = 512 if _SMALL_VMEM else 1024
_DEF_TILE_K = 512
_DEF_TILE_Q = 256 if _SMALL_VMEM else 512
_DEF_TILE_Q_SCORES = 128 if _SMALL_VMEM else 256     # scores block is the VMEM hog


def _pick_tile(dim, tile, align):
    """Use the full dim if it fits in one block, else an `align`-aligned tile."""
    if dim <= tile:
        return dim
    return max(align, (tile // align) * align)


def _itemsize(dtype):
    return np.dtype(dtype).itemsize


# ----------------------------- linear kernels -----------------------------

def _linear_kernel(x_ref, w_ref, b_ref, o_ref, acc_ref):
    # x: (tm, tk) bf16, w: (tk, tn) bf16, b: (1, tn) f32, o: (tm, tn), acc f32.
    @pl.when(pl.program_id(2) == 0)
    def _():
        acc_ref[...] = jnp.zeros_like(acc_ref)

    acc_ref[...] += jnp.dot(x_ref[...], w_ref[...],
                            preferred_element_type=jnp.float32)

    @pl.when(pl.program_id(2) == pl.num_programs(2) - 1)
    def _():
        o_ref[...] = (acc_ref[...] + b_ref[...]).astype(o_ref.dtype)


def pallas_linear(x2d, w, b, *, out_dtype=None,
                  tile_m=_DEF_TILE_M, tile_n=_DEF_TILE_N, tile_k=_DEF_TILE_K):
    """x2d: (M, d_in) @ w: (d_in, d_out) + b: (d_out,) -> (M, d_out).

    Tiled over (M rows, N cols, K reduction); bf16 MXU operands, f32 VMEM
    accumulator, f32 bias add at finalize.
    """
    M, d_in = x2d.shape
    d_out = w.shape[1]
    out_dtype = out_dtype or x2d.dtype
    tm = _pick_tile(M, tile_m, 8)
    tn = _pick_tile(d_out, tile_n, 128)
    tk = _pick_tile(d_in, tile_k, 128)
    grid = (pl.cdiv(M, tm), pl.cdiv(d_out, tn), pl.cdiv(d_in, tk))
    bytes_io = int(x2d.size * _itemsize(x2d.dtype) + w.size * _itemsize(w.dtype)
                   + b.size * 4 + M * d_out * _itemsize(out_dtype))
    cost = pl.CostEstimate(flops=int(2 * M * d_in * d_out), transcendentals=0,
                           bytes_accessed=bytes_io)
    return pl.pallas_call(
        _linear_kernel,
        grid=grid,
        in_specs=[
            pl.BlockSpec((tm, tk), lambda i, j, k: (i, k)),
            pl.BlockSpec((tk, tn), lambda i, j, k: (k, j)),
            pl.BlockSpec((1, tn), lambda i, j, k: (0, j)),
        ],
        out_specs=pl.BlockSpec((tm, tn), lambda i, j, k: (i, j)),
        out_shape=jax.ShapeDtypeStruct((M, d_out), out_dtype),
        scratch_shapes=[pltpu.VMEM((tm, tn), jnp.float32)],
        compiler_params=pltpu.CompilerParams(
            dimension_semantics=("parallel", "parallel", "arbitrary"),
            vmem_limit_bytes=_VMEM_LIMIT,
        ),
        cost_estimate=cost,
    )(x2d, w, b.reshape(1, d_out).astype(jnp.float32))


def _qkv_kernel(x_ref, w_ref, b_ref, q_ref, k_ref, v_ref, acc_ref):
    # x: (tm, tk), w: (3, tk, tn), b: (3, 1, tn) f32, outputs (tm, tn) x3,
    # acc: (3, tm, tn) f32.  The x tile is loaded once and shared by the three
    # contractions, so the activation is read from HBM once for Q, K and V.
    @pl.when(pl.program_id(2) == 0)
    def _():
        acc_ref[...] = jnp.zeros_like(acc_ref)

    x = x_ref[...]
    for idx in range(3):
        acc_ref[idx] += jnp.dot(x, w_ref[idx],
                                preferred_element_type=jnp.float32)

    @pl.when(pl.program_id(2) == pl.num_programs(2) - 1)
    def _():
        for idx, o_ref in enumerate((q_ref, k_ref, v_ref)):
            o_ref[...] = (acc_ref[idx] + b_ref[idx]).astype(o_ref.dtype)


def pallas_qkv_proj(x2d, w_qkv, b_qkv, *, out_dtype=None,
                    tile_m=_DEF_TILE_M, tile_n=_DEF_TILE_N, tile_k=_DEF_TILE_K):
    """Fused Q/K/V projection.  x2d: (M, d_in); w_qkv: (3, d_in, d_out) bf16;
    b_qkv: (3, 1, d_out) f32.  Returns (q, k, v), each (M, d_out)."""
    M, d_in = x2d.shape
    d_out = w_qkv.shape[2]
    out_dtype = out_dtype or x2d.dtype
    tm = _pick_tile(M, tile_m, 8)
    tn = _pick_tile(d_out, tile_n, 128)
    tk = _pick_tile(d_in, tile_k, 128)
    grid = (pl.cdiv(M, tm), pl.cdiv(d_out, tn), pl.cdiv(d_in, tk))
    out_struct = jax.ShapeDtypeStruct((M, d_out), out_dtype)
    out_spec = pl.BlockSpec((tm, tn), lambda i, j, k: (i, j))
    bytes_io = int(x2d.size * _itemsize(x2d.dtype) + w_qkv.size * _itemsize(w_qkv.dtype)
                   + b_qkv.size * 4 + 3 * M * d_out * _itemsize(out_dtype))
    cost = pl.CostEstimate(flops=int(2 * M * d_in * d_out * 3), transcendentals=0,
                           bytes_accessed=bytes_io)
    return pl.pallas_call(
        _qkv_kernel,
        grid=grid,
        in_specs=[
            pl.BlockSpec((tm, tk), lambda i, j, k: (i, k)),        # shared by q/k/v
            pl.BlockSpec((3, tk, tn), lambda i, j, k: (0, k, j)),
            pl.BlockSpec((3, 1, tn), lambda i, j, k: (0, 0, j)),
        ],
        out_specs=(out_spec, out_spec, out_spec),
        out_shape=(out_struct, out_struct, out_struct),
        scratch_shapes=[pltpu.VMEM((3, tm, tn), jnp.float32)],
        compiler_params=pltpu.CompilerParams(
            dimension_semantics=("parallel", "parallel", "arbitrary"),
            vmem_limit_bytes=_VMEM_LIMIT,
        ),
        cost_estimate=cost,
    )(x2d, w_qkv, b_qkv)


# ---------------------------- attention kernel ----------------------------

def _attention_kernel(q_ref, k_ref, v_ref, o_ref, *rest,
                      heads, d_k, inv_sqrt_dk, with_scores):
    # q: (tq, d_model) bf16, k/v: (sk, d_model) bf16, o: (tq, d_model),
    # optional s: (heads, tq, sk), acc scratch: (tq, d_model) f32.
    # NOTE: if sq % tq != 0, the padded rows of the last q block run softmax on
    # whatever is resident in VMEM (can be inf/NaN); those rows are never
    # written back to a valid output region, so real results are unaffected.
    if with_scores:
        s_ref, acc_ref = rest
    else:
        s_ref = None
        (acc_ref,) = rest

    q_all = q_ref[...]
    k_all = k_ref[...]
    v_all = v_ref[...]
    for h in range(heads):
        lo = h * d_k
        qh = q_all[:, lo:lo + d_k]
        kh = k_all[:, lo:lo + d_k]
        vh = v_all[:, lo:lo + d_k]
        # QK^T via transposed contraction (no explicit k.T materialization);
        # bf16 operands feed the MXU, accumulation is f32.
        scores = jax.lax.dot_general(
            qh, kh, dimension_numbers=(((1,), (1,)), ((), ())),
            preferred_element_type=jnp.float32) * inv_sqrt_dk
        scores = scores - jnp.max(scores, axis=-1, keepdims=True)
        p = jnp.exp(scores)                                   # f32 softmax math
        denom = jnp.sum(p, axis=-1, keepdims=True)
        inv = pl.reciprocal(denom, approx=True)               # EUP vrcp (free slot)
        inv = inv * (2.0 - denom * inv)                       # Newton step -> ~f32 exact
        p = p * inv
        if s_ref is not None:
            s_ref[h] = p.astype(s_ref.dtype)
        pv = jnp.dot(p.astype(vh.dtype), vh, preferred_element_type=jnp.float32)
        # Drain this head's result into the f32 scratch accumulator instead of
        # keeping `heads` live results and concatenating along the lane dim.
        acc_ref[:, lo:lo + d_k] = pv
    # Single lane-dense (d_model-wide) store.
    o_ref[...] = acc_ref[...].astype(o_ref.dtype)


def pallas_attention(qp, kp, vp, heads, d_k, *, return_scores=False,
                     scores_dtype=jnp.bfloat16, tile_q=None):
    """qp: (bs, sq, d_model), kp/vp: (bs, sk, d_model) in (seq, head*d_k) layout.

    Head split/merge is folded into the kernel (no wrapper transposes).
    Returns the attention output (bs, sq, d_model) and, optionally, the full
    attention probabilities (bs, heads, sq, sk).
    """
    bs, sq, d_model = qp.shape
    sk = kp.shape[1]
    if tile_q is None:
        tile_q = _DEF_TILE_Q_SCORES if return_scores else _DEF_TILE_Q
    tq = _pick_tile(sq, tile_q, 8)
    grid = (bs, pl.cdiv(sq, tq))

    kern = functools.partial(
        _attention_kernel, heads=heads, d_k=d_k,
        inv_sqrt_dk=1.0 / math.sqrt(d_k), with_scores=return_scores)

    q_spec = pl.BlockSpec((pl.Squeezed(), tq, d_model), lambda b, qi: (b, qi, 0))
    kv_spec = pl.BlockSpec((pl.Squeezed(), sk, d_model), lambda b, qi: (b, 0, 0))
    o_spec = pl.BlockSpec((pl.Squeezed(), tq, d_model), lambda b, qi: (b, qi, 0))
    o_struct = jax.ShapeDtypeStruct((bs, sq, d_model), qp.dtype)

    flops = 4 * bs * heads * sq * sk * d_k          # QK^T + PV
    trans = bs * heads * sq * sk                    # exp
    bytes_io = ((qp.size + kp.size + vp.size) * _itemsize(qp.dtype)
                + bs * sq * d_model * _itemsize(qp.dtype))
    if return_scores:
        bytes_io += bs * heads * sq * sk * _itemsize(scores_dtype)
        s_spec = pl.BlockSpec((pl.Squeezed(), heads, tq, sk),
                              lambda b, qi: (b, 0, qi, 0))
        s_struct = jax.ShapeDtypeStruct((bs, heads, sq, sk), scores_dtype)
        out_specs = (o_spec, s_spec)
        out_shape = (o_struct, s_struct)
    else:
        out_specs = o_spec
        out_shape = o_struct

    return pl.pallas_call(
        kern,
        grid=grid,
        in_specs=[q_spec, kv_spec, kv_spec],
        out_specs=out_specs,
        out_shape=out_shape,
        scratch_shapes=[pltpu.VMEM((tq, d_model), jnp.float32)],
        compiler_params=pltpu.CompilerParams(
            # Both axes "parallel": the K/V index_map ignores qi, so per-core
            # residency is preserved and bs==1 still shards across TensorCores.
            dimension_semantics=("parallel", "parallel"),
            vmem_limit_bytes=_VMEM_LIMIT,
        ),
        cost_estimate=pl.CostEstimate(flops=int(flops), transcendentals=int(trans),
                                      bytes_accessed=int(bytes_io)),
    )(qp, kp, vp)


# ----------------------------- Module wrapper -----------------------------

class MultiHeadAttentionPallas:
    """Pallas-TPU forward pass for the PyTorch MultiHeadAttention (eval mode).

    Weights are stored in bf16 (MXU-native); accumulation and softmax math are
    f32, so results track the f32 reference to ~1e-2.
    """

    def __init__(self, heads, d_model, key, dropout=0.1,
                 param_dtype=jnp.bfloat16, scores_dtype=jnp.bfloat16):
        assert d_model % heads == 0
        self.d_model = d_model
        self.h = heads
        self.d_k = d_model // heads
        self.param_dtype = param_dtype
        self.scores_dtype = scores_dtype
        self.scores = None

        ks = jax.random.split(key, 8)
        scale = 1.0 / math.sqrt(d_model)

        def init_linear(kw, kb):
            # Stored as (in, out); PyTorch's nn.Linear stores (out, in).
            w = jax.random.uniform(kw, (d_model, d_model), jnp.float32, -scale, scale)
            b = jax.random.uniform(kb, (d_model,), jnp.float32, -scale, scale)
            # Weights in bf16 for the MXU; bias stays f32 (added post-accumulate).
            return w.astype(param_dtype), b

        self.q_w, self.q_b = init_linear(ks[0], ks[1])
        self.k_w, self.k_b = init_linear(ks[2], ks[3])
        self.v_w, self.v_b = init_linear(ks[4], ks[5])
        self.o_w, self.o_b = init_linear(ks[6], ks[7])

        # Stacked Q/K/V params for the fused projection kernel.
        self.qkv_w = jnp.stack([self.q_w, self.k_w, self.v_w])               # (3, d, d) bf16
        self.qkv_b = jnp.stack([self.q_b, self.k_b, self.v_b])[:, None, :]   # (3, 1, d) f32

    def __call__(self, q, k, v, mask=None, return_scores=True,
                 is_self_attention=None):
        assert mask is None  # TODO(synk): mask path not implemented.
        out_dtype = q.dtype
        bs, sq, d_model = q.shape
        sk = k.shape[1]

        if is_self_attention is None:
            # Object-identity check only.  Under jit with distinct-but-equal
            # tracers pass is_self_attention=True explicitly to keep the fused
            # single-read QKV projection.
            is_self_attention = (q is k) and (k is v)

        compute_dtype = self.param_dtype
        qx = q.reshape(bs * sq, d_model).astype(compute_dtype)

        if is_self_attention:
            # Self-attention: fused projection reads the activation from HBM once.
            qp, kp, vp = pallas_qkv_proj(qx, self.qkv_w, self.qkv_b)
        else:
            kx = k.reshape(bs * sk, d_model).astype(compute_dtype)
            vx = v.reshape(bs * sk, d_model).astype(compute_dtype)
            qp = pallas_linear(qx, self.q_w, self.q_b)
            kp = pallas_linear(kx, self.k_w, self.k_b)
            vp = pallas_linear(vx, self.v_w, self.v_b)

        # (bs, seq, d_model) layout kept end-to-end; head split/merge happens
        # inside the attention kernel (no transposes / extra HBM round trips).
        qp = qp.reshape(bs, sq, d_model)
        kp = kp.reshape(bs, sk, d_model)
        vp = vp.reshape(bs, sk, d_model)

        if return_scores:
            attn_out, probs = pallas_attention(
                qp, kp, vp, self.h, self.d_k, return_scores=True,
                scores_dtype=self.scores_dtype)
            self.scores = probs
        else:
            # Fast path: skips the O(bs*h*sq*sk) probability writeback.
            attn_out = pallas_attention(qp, kp, vp, self.h, self.d_k,
                                        return_scores=False)

        out = pallas_linear(attn_out.reshape(bs * sq, d_model),
                            self.o_w, self.o_b, out_dtype=out_dtype)
        return out.reshape(bs, sq, d_model)

    def get_scores(self):
        return self.scores


# ------------------------- Pure-JAX reference check -------------------------

def reference_forward(mha, q, k, v):
    bs, sq, d_model = q.shape
    sk = k.shape[1]
    h, d_k = mha.h, mha.d_k
    qp = q.reshape(bs * sq, d_model) @ mha.q_w + mha.q_b
    kp = k.reshape(bs * sk, d_model) @ mha.k_w + mha.k_b
    vp = v.reshape(bs * sk, d_model) @ mha.v_w + mha.v_b
    qh = qp.reshape(bs, sq, h, d_k).transpose(0, 2, 1, 3)
    kh = kp.reshape(bs, sk, h, d_k).transpose(0, 2, 1, 3)
    vh = vp.reshape(bs, sk, h, d_k).transpose(0, 2, 1, 3)
    s = jnp.einsum("bhqd,bhkd->bhqk", qh, kh) / math.sqrt(d_k)
    p = jax.nn.softmax(s, axis=-1)
    o = jnp.einsum("bhqk,bhkd->bhqd", p, vh)
    concat = o.transpose(0, 2, 1, 3).reshape(bs * sq, d_model)
    out = (concat @ mha.o_w + mha.o_b).reshape(bs, sq, d_model)
    return out, p


if __name__ == "__main__":
    key = jax.random.PRNGKey(0)
    k_param, kx, kq, kk, kv = jax.random.split(key, 5)

    heads, d_model = 4, 32
    bs, seq, seq_kv = 2, 8, 16

    mha = MultiHeadAttentionPallas(heads, d_model, k_param)

    # --- self-attention (fused QKV projection path) ---
    x = jax.random.normal(kx, (bs, seq, d_model), jnp.float32)
    out = jax.block_until_ready(mha(x, x, x))
    ref_out, ref_p = reference_forward(mha, x, x, x)
    assert out.shape == (bs, seq, d_model) and out.dtype == jnp.float32
    assert mha.get_scores().shape == (bs, heads, seq, seq)
    assert jnp.allclose(out, ref_out, atol=5e-2, rtol=5e-2)
    assert jnp.allclose(mha.get_scores().astype(jnp.float32), ref_p,
                        atol=3e-2, rtol=3e-2)

    # --- cross-attention (separate projections, rectangular scores) ---
    q = jax.random.normal(kq, (bs, seq, d_model), jnp.float32)
    k = jax.random.normal(kk, (bs, seq_kv, d_model), jnp.float32)
    v = jax.random.normal(kv, (bs, seq_kv, d_model), jnp.float32)
    out2 = jax.block_until_ready(mha(q, k, v))
    ref_out2, ref_p2 = reference_forward(mha, q, k, v)
    assert out2.shape == (bs, seq, d_model)
    assert mha.get_scores().shape == (bs, heads, seq, seq_kv)
    assert jnp.allclose(out2, ref_out2, atol=5e-2, rtol=5e-2)
    assert jnp.allclose(mha.get_scores().astype(jnp.float32), ref_p2,
                        atol=3e-2, rtol=3e-2)

    # --- scores-free path (skips the O(seq^2) probability writeback) ---
    out3 = jax.block_until_ready(mha(x, x, x, return_scores=False))
    assert jnp.allclose(out3, ref_out, atol=5e-2, rtol=5e-2)

    print("KERNEL_OK")
</pallas_src>

<mosaic_0001>
module attributes {stable_mosaic.version = 11 : i64} {
  func.func @_qkv_kernel(%arg0: i32, %arg1: i32, %arg2: i32, %arg3: memref<16x32xbf16, #tpu.memory_space<vmem>>, %arg4: memref<3x32x32xbf16, #tpu.memory_space<vmem>>, %arg5: memref<3x1x32xf32, #tpu.memory_space<vmem>>, %arg6: memref<16x32xbf16, #tpu.memory_space<vmem>>, %arg7: memref<16x32xbf16, #tpu.memory_space<vmem>>, %arg8: memref<16x32xbf16, #tpu.memory_space<vmem>>, %arg9: memref<3x16x32xf32, #tpu.memory_space<vmem>>) attributes {dimension_semantics = [#tpu.dimension_semantics<parallel>, #tpu.dimension_semantics<parallel>, #tpu.dimension_semantics<arbitrary>], iteration_bounds = array<i64: 1, 1, 1>, scalar_prefetch = 0 : i64, scratch_operands = 1 : i64, tpu.core_type = #tpu.core_type<tc>, window_params = [{transform_indices = @transform_0, window_bounds = array<i64: 16, 32>}, {transform_indices = @transform_1, window_bounds = array<i64: 3, 32, 32>}, {transform_indices = @transform_2, window_bounds = array<i64: 3, 1, 32>}, {transform_indices = @transform_3, window_bounds = array<i64: 16, 32>}, {transform_indices = @transform_4, window_bounds = array<i64: 16, 32>}, {transform_indices = @transform_5, window_bounds = array<i64: 16, 32>}]} {
    %c0_i32 = arith.constant 0 : i32
    %0 = arith.cmpi eq, %arg2, %c0_i32 : i32
    %1 = arith.extui %0 : i1 to i32
    %c0_i32_0 = arith.constant 0 : i32
    %2 = arith.cmpi ne, %1, %c0_i32_0 : i32
    scf.if %2 {
      %cst_31 = arith.constant 0.000000e+00 : f32
      %34 = vector.broadcast %cst_31 : f32 to vector<3x16x32xf32>
      %c0_32 = arith.constant 0 : index
      %c0_33 = arith.constant 0 : index
      %c0_34 = arith.constant 0 : index
      %35 = vector.load %arg9[%c0_32, %c0_33, %c0_34] : memref<3x16x32xf32, #tpu.memory_space<vmem>>, vector<3x16x32xf32>
      tpu.vector_store %arg9[%c0_32, %c0_33, %c0_34], %34 {strides = array<i32>} : memref<3x16x32xf32, #tpu.memory_space<vmem>>, vector<3x16x32xf32>,
    } else {
    }
    %c0 = arith.constant 0 : index
    %c0_1 = arith.constant 0 : index
    %3 = vector.load %arg3[%c0, %c0_1] : memref<16x32xbf16, #tpu.memory_space<vmem>>, vector<16x32xbf16>
    %c0_2 = arith.constant 0 : index
    %c0_3 = arith.constant 0 : index
    %c0_4 = arith.constant 0 : index
    %4 = vector.load %arg9[%c0_2, %c0_3, %c0_4] : memref<3x16x32xf32, #tpu.memory_space<vmem>>, vector<1x16x32xf32>
    %5 = vector.shape_cast %4 : vector<1x16x32xf32> to vector<16x32xf32>
    %c0_5 = arith.constant 0 : index
    %c0_6 = arith.constant 0 : index
    %c0_7 = arith.constant 0 : index
    %6 = vector.load %arg4[%c0_5, %c0_6, %c0_7] : memref<3x32x32xbf16, #tpu.memory_space<vmem>>, vector<1x32x32xbf16>
    %7 = vector.shape_cast %6 : vector<1x32x32xbf16> to vector<32x32xbf16>
    %cst = arith.constant dense<0.000000e+00> : vector<16x32xf32>
    %8 = tpu.matmul %3, %7, %cst {dimension_numbers = #tpu.dot_dimension_numbers<[1], [0], [0], [1], [0, 0, 1, 1], [], []>} : vector<16x32xbf16>, vector<32x32xbf16>, vector<16x32xf32> -> vector<16x32xf32>
    %9 = arith.addf %5, %8 : vector<16x32xf32>
    %c0_8 = arith.constant 0 : index
    %c0_9 = arith.constant 0 : index
    %c0_10 = arith.constant 0 : index
    %10 = vector.load %arg9[%c0_8, %c0_9, %c0_10] : memref<3x16x32xf32, #tpu.memory_space<vmem>>, vector<1x16x32xf32>
    %11 = vector.shape_cast %10 : vector<1x16x32xf32> to vector<16x32xf32>
    %12 = vector.shape_cast %9 : vector<16x32xf32> to vector<1x16x32xf32>
    tpu.vector_store %arg9[%c0_8, %c0_9, %c0_10], %12 {strides = array<i32>} : memref<3x16x32xf32, #tpu.memory_space<vmem>>, vector<1x16x32xf32>,
    %c1 = arith.constant 1 : index
    %c0_11 = arith.constant 0 : index
    %c0_12 = arith.constant 0 : index
    %13 = vector.load %arg9[%c1, %c0_11, %c0_12] : memref<3x16x32xf32, #tpu.memory_space<vmem>>, vector<1x16x32xf32>
    %14 = vector.shape_cast %13 : vector<1x16x32xf32> to vector<16x32xf32>
    %c1_13 = arith.constant 1 : index
    %c0_14 = arith.constant 0 : index
    %c0_15 = arith.constant 0 : index
    %15 = vector.load %arg4[%c1_13, %c0_14, %c0_15] : memref<3x32x32xbf16, #tpu.memory_space<vmem>>, vector<1x32x32xbf16>
    %16 = vector.shape_cast %15 : vector<1x32x32xbf16> to vector<32x32xbf16>
    %cst_16 = arith.constant dense<0.000000e+00> : vector<16x32xf32>
    %17 = tpu.matmul %3, %16, %cst_16 {dimension_numbers = #tpu.dot_dimension_numbers<[1], [0], [0], [1], [0, 0, 1, 1], [], []>} : vector<16x32xbf16>, vector<32x32xbf16>, vector<16x32xf32> -> vector<16x32xf32>
    %18 = arith.addf %14, %17 : vector<16x32xf32>
    %c1_17 = arith.constant 1 : index
    %c0_18 = arith.constant 0 : index
    %c0_19 = arith.constant 0 : index
    %19 = vector.load %arg9[%c1_17, %c0_18, %c0_19] : memref<3x16x32xf32, #tpu.memory_space<vmem>>, vector<1x16x32xf32>
    %20 = vector.shape_cast %19 : vector<1x16x32xf32> to vector<16x32xf32>
    %21 = vector.shape_cast %18 : vector<16x32xf32> to vector<1x16x32xf32>
    tpu.vector_store %arg9[%c1_17, %c0_18, %c0_19], %21 {strides = array<i32>} : memref<3x16x32xf32, #tpu.memory_space<vmem>>, vector<1x16x32xf32>,
    %c2 = arith.constant 2 : index
    %c0_20 = arith.constant 0 : index
    %c0_21 = arith.constant 0 : index
    %22 = vector.load %arg9[%c2, %c0_20, %c0_21] : memref<3x16x32xf32, #tpu.memory_space<vmem>>, vector<1x16x32xf32>
    %23 = vector.shape_cast %22 : vector<1x16x32xf32> to vector<16x32xf32>
    %c2_22 = arith.constant 2 : index
    %c0_23 = arith.constant 0 : index
    %c0_24 = arith.constant 0 : index
    %24 = vector.load %arg4[%c2_22, %c0_23, %c0_24] : memref<3x32x32xbf16, #tpu.memory_space<vmem>>, vector<1x32x32xbf16>
    %25 = vector.shape_cast %24 : vector<1x32x32xbf16> to vector<32x32xbf16>
    %cst_25 = arith.constant dense<0.000000e+00> : vector<16x32xf32>
    %26 = tpu.matmul %3, %25, %cst_25 {dimension_numbers = #tpu.dot_dimension_numbers<[1], [0], [0], [1], [0, 0, 1, 1], [], []>} : vector<16x32xbf16>, vector<32x32xbf16>, vector<16x32xf32> -> vector<16x32xf32>
    %27 = arith.addf %23, %26 : vector<16x32xf32>
    %c2_26 = arith.constant 2 : index
    %c0_27 = arith.constant 0 : index
    %c0_28 = arith.constant 0 : index
    %28 = vector.load %arg9[%c2_26, %c0_27, %c0_28] : memref<3x16x32xf32, #tpu.memory_space<vmem>>, vector<1x16x32xf32>
    %29 = vector.shape_cast %28 : vector<1x16x32xf32> to vector<16x32xf32>
    %30 = vector.shape_cast %27 : vector<16x32xf32> to vector<1x16x32xf32>
    tpu.vector_store %arg9[%c2_26, %c0_27, %c0_28], %30 {strides = array<i32>} : memref<3x16x32xf32, #tpu.memory_space<vmem>>, vector<1x16x32xf32>,
    %c0_i32_29 = arith.constant 0 : i32
    %31 = arith.cmpi eq, %arg2, %c0_i32_29 : i32
    %32 = arith.extui %31 : i1 to i32
    %c0_i32_30 = arith.constant 0 : i32
    %33 = arith.cmpi ne, %32, %c0_i32_30 : i32
    scf.if %33 {
      %c0_31 = arith.constant 0 : index
      %c0_32 = arith.constant 0 : index
      %c0_33 = arith.constant 0 : index
      %34 = vector.load %arg9[%c0_31, %c0_32, %c0_33] : memref<3x16x32xf32, #tpu.memory_space<vmem>>, vector<1x16x32xf32>
      %35 = vector.shape_cast %34 : vector<1x16x32xf32> to vector<16x32xf32>
      %c0_34 = arith.constant 0 : index
      %c0_35 = arith.constant 0 : index
      %c0_36 = arith.constant 0 : index
      %36 = vector.load %arg5[%c0_34, %c0_35, %c0_36] : memref<3x1x32xf32, #tpu.memory_space<vmem>>, vector<1x1x32xf32>
      %37 = vector.shape_cast %36 : vector<1x1x32xf32> to vector<1x32xf32>
      %38 = vector.broadcast %37 : vector<1x32xf32> to vector<16x32xf32>
      %39 = arith.addf %35, %38 : vector<16x32xf32>
      %40 = arith.truncf %39 : vector<16x32xf32> to vector<16x32xbf16>
      %c0_37 = arith.constant 0 : index
      %c0_38 = arith.constant 0 : index
      %41 = vector.load %arg6[%c0_37, %c0_38] : memref<16x32xbf16, #tpu.memory_space<vmem>>, vector<16x32xbf16>
      tpu.vector_store %arg6[%c0_37, %c0_38], %40 {strides = array<i32>} : memref<16x32xbf16, #tpu.memory_space<vmem>>, vector<16x32xbf16>,
      %c1_39 = arith.constant 1 : index
      %c0_40 = arith.constant 0 : index
      %c0_41 = arith.constant 0 : index
      %42 = vector.load %arg9[%c1_39, %c0_40, %c0_41] : memref<3x16x32xf32, #tpu.memory_space<vmem>>, vector<1x16x32xf32>
      %43 = vector.shape_cast %42 : vector<1x16x32xf32> to vector<16x32xf32>
      %c1_42 = arith.constant 1 : index
      %c0_43 = arith.constant 0 : index
      %c0_44 = arith.constant 0 : index
      %44 = vector.load %arg5[%c1_42, %c0_43, %c0_44] : memref<3x1x32xf32, #tpu.memory_space<vmem>>, vector<1x1x32xf32>
      %45 = vector.shape_cast %44 : vector<1x1x32xf32> to vector<1x32xf32>
      %46 = vector.broadcast %45 : vector<1x32xf32> to vector<16x32xf32>
      %47 = arith.addf %43, %46 : vector<16x32xf32>
      %48 = arith.truncf %47 : vector<16x32xf32> to vector<16x32xbf16>
      %c0_45 = arith.constant 0 : index
      %c0_46 = arith.constant 0 : index
      %49 = vector.load %arg7[%c0_45, %c0_46] : memref<16x32xbf16, #tpu.memory_space<vmem>>, vector<16x32xbf16>
      tpu.vector_store %arg7[%c0_45, %c0_46], %48 {strides = array<i32>} : memref<16x32xbf16, #tpu.memory_space<vmem>>, vector<16x32xbf16>,
      %c2_47 = arith.constant 2 : index
      %c0_48 = arith.constant 0 : index
      %c0_49 = arith.constant 0 : index
      %50 = vector.load %arg9[%c2_47, %c0_48, %c0_49] : memref<3x16x32xf32, #tpu.memory_space<vmem>>, vector<1x16x32xf32>
      %51 = vector.shape_cast %50 : vector<1x16x32xf32> to vector<16x32xf32>
      %c2_50 = arith.constant 2 : index
      %c0_51 = arith.constant 0 : index
      %c0_52 = arith.constant 0 : index
      %52 = vector.load %arg5[%c2_50, %c0_51, %c0_52] : memref<3x1x32xf32, #tpu.memory_space<vmem>>, vector<1x1x32xf32>
      %53 = vector.shape_cast %52 : vector<1x1x32xf32> to vector<1x32xf32>
      %54 = vector.broadcast %53 : vector<1x32xf32> to vector<16x32xf32>
      %55 = arith.addf %51, %54 : vector<16x32xf32>
      %56 = arith.truncf %55 : vector<16x32xf32> to vector<16x32xbf16>
      %c0_53 = arith.constant 0 : index
      %c0_54 = arith.constant 0 : index
      %57 = vector.load %arg8[%c0_53, %c0_54] : memref<16x32xbf16, #tpu.memory_space<vmem>>, vector<16x32xbf16>
      tpu.vector_store %arg8[%c0_53, %c0_54], %56 {strides = array<i32>} : memref<16x32xbf16, #tpu.memory_space<vmem>>, vector<16x32xbf16>,
    } else {
    }
    return
  }
  func.func @transform_0(%arg0: i32, %arg1: i32, %arg2: i32) -> (i32, i32) {
    %c0_i32 = arith.constant 0 : i32
    return %arg0, %arg2 : i32, i32
  }
  func.func @transform_1(%arg0: i32, %arg1: i32, %arg2: i32) -> (i32, i32, i32) {
    %c0_i32 = arith.constant 0 : i32
    %c0_i32_0 = arith.constant 0 : i32
    return %c0_i32, %arg2, %arg1 : i32, i32, i32
  }
  func.func @transform_2(%arg0: i32, %arg1: i32, %arg2: i32) -> (i32, i32, i32) {
    %c0_i32 = arith.constant 0 : i32
    %c0_i32_0 = arith.constant 0 : i32
    %c0_i32_1 = arith.constant 0 : i32
    return %c0_i32, %c0_i32_0, %arg1 : i32, i32, i32
  }
  func.func @transform_3(%arg0: i32, %arg1: i32, %arg2: i32) -> (i32, i32) {
    %c0_i32 = arith.constant 0 : i32
    return %arg0, %arg1 : i32, i32
  }
  func.func @transform_4(%arg0: i32, %arg1: i32, %arg2: i32) -> (i32, i32) {
    %c0_i32 = arith.constant 0 : i32
    return %arg0, %arg1 : i32, i32
  }
  func.func @transform_5(%arg0: i32, %arg1: i32, %arg2: i32) -> (i32, i32) {
    %c0_i32 = arith.constant 0 : i32
    return %arg0, %arg1 : i32, i32
  }
}

</mosaic_0001>

<bundles_post_ra>
// kernel: tpu_custom_call.1
= control target key start
LH: loop header
LB: loop body
LE: loop exit
PB: predicated region body
PF: predicated region fallthrough
CT: control target
= control target key end

     0   :  { %11 = vsyncpa [#allocation4], 0  ;;  %s729_s0 = inlined_call_operand.hbm [shape: bf16[16,32], index: 0, kind: input, shape index: {}]   ;;  %s730_s1 = inlined_call_operand.hbm [shape: bf16[3,32,32], index: 1, kind: input, shape index: {}]   ;;  %s731_s2 = inlined_call_operand.vmem [shape: f32[3,1,32], index: 2, kind: input, shape index: {}]   ;;  %s732_s3 = inlined_call_operand.hbm [shape: bf16[16,32], index: 3, kind: output, shape index: {0}]   ;;  %s733_s4 = inlined_call_operand.hbm [shape: bf16[16,32], index: 4, kind: output, shape index: {1}]   ;;  %s734_s5 = inlined_call_operand.hbm [shape: bf16[16,32], index: 5, kind: output, shape index: {2}]  }
   0x1   :  { %12 = vsyncpa [#allocation7], 0 }
   0x2   :  { %13 = vsyncpa [#allocation5], 0 }
   0x3   :  { %14 = vsyncpa [#allocation10], 0  ;;  %s575_s18 = smov [#allocation3]   ;;  %s457_s22 = scalar_lea.hbm %s729_s0, 128 }
   0x4   :  { %s20_s19 = sshll.u32 %s575_s18, 4  ;;  %p458_p0 = scmp.ne.s32.totalorder %s729_s0, %s457_s22  ;;  %s21_s19 = int_to_ptr.vmem [resolvable:$true] %s20_s19 }
   0x5   :  { %p461_p1 = scmp.lt.u32.totalorder %s457_s22, %s729_s0 }
   0x7   :  { %p463_p2 = pnand %p461_p1, %p458_p0 }
   0x9   :  { %466 = shalt.err (!%p463_p2)
}
   0xa   :  { %s467_s27 = scalar_lea.vmem %s21_s19, 128  ;;  %p472_p4 = scmp.lt.s32.totalorder %s21_s19, %s21_s19 }
   0xb   :  { %p468_p3 = scmp.ne.s32.totalorder %s21_s19, %s467_s27  ;;  %p473_p5 = scmp.lt.s32.totalorder %s467_s27, %s467_s27 }
   0xd   :  { %p474_p6 = por %p473_p5, %p472_p4 }
   0xf   :  { %p475_p7 = pnand %p474_p6, %p468_p3 }
  0x11   :  { %478 = shalt.err (!%p475_p7)
}
  0x12   :  { %s576_s28 = smov 64   ;;  %s577_s29 = smov 4  }
  0x13   :  { %26 = dma.hbm_to_vmem [thread:$0]  %s729_s0, 128, %s21_s19, [#allocation4], %s576_s28, %s576_s28, %s577_s29  }
  0x14   :  { %s578_s7 = smov [#allocation6]   ;;  %s479_s11 = scalar_lea.hbm %s730_s1, 768 }
  0x15   :  { %s32_s8 = sshll.u32 %s578_s7, 4  ;;  %p480_p8 = scmp.ne.s32.totalorder %s730_s1, %s479_s11  ;;  %s33_s8 = int_to_ptr.vmem [resolvable:$true] %s32_s8 }
  0x16   :  { %p483_p9 = scmp.lt.u32.totalorder %s479_s11, %s730_s1 }
  0x18   :  { %p485_p10 = pnand %p483_p9, %p480_p8 }
  0x1a   :  { %488 = shalt.err (!%p485_p10)
}
  0x1b   :  { %s489_s16 = scalar_lea.vmem %s33_s8, 768  ;;  %p494_p12 = scmp.lt.s32.totalorder %s33_s8, %s33_s8 }
  0x1c   :  { %p490_p11 = scmp.ne.s32.totalorder %s33_s8, %s489_s16  ;;  %p495_p13 = scmp.lt.s32.totalorder %s489_s16, %s489_s16 }
  0x1e   :  { %p496_p0 = por %p495_p13, %p494_p12 }
  0x20   :  { %p497_p1 = pnand %p496_p0, %p490_p11 }
  0x22   :  { %500 = shalt.err (!%p497_p1)
}
  0x23   :  { %38 = dma.hbm_to_vmem [thread:$0]  %s730_s1, 768, %s33_s8, [#allocation7], %s576_s28, %s576_s28, %s577_s29  }
  0x24   :  { %567 = dma.done.wait [#allocation4], 128  }
  0x25   :  { %568 = vsyncadd [#allocation4], 4294967168 }
  0x26   :  { %569 = dma.done.wait [#allocation7], 768  }
  0x27   :  { %570 = vsyncadd [#allocation7], 4294966528  ;;  %vm52_vm0 = vcmask 261120   ;;  %v579_v0 = vmov 0.0   ;;  %vm580_vm1 = vmmov 0   ;;  %v450_v1 = vld [vmem:[#allocation6] sm:$0xff]  }
  0x28   :  { %417 = vmatprep.subr.bf16.mxu0 %v579_v0  ;;  %425 = vmatprep.subr.bf16.mxu1 %v579_v0  ;;  %53 = vst.msk [vmem:[#allocation2] sm:$0xff] %vm52_vm0, %v579_v0  ;;  %54 = vst.msk [vmem:[#allocation2 + $0x8] sm:$0xff] %vm52_vm0, %v579_v0  ;;  %v451_v2 = vld [vmem:[#allocation6 + $0x8] sm:$0xff]   ;;  %v452_v3 = vld [vmem:[#allocation6 + $0x10] sm:$0xff]   ;;  %vm285_vm2 = vcmask 257024   ;;  %s581_s21 = smov [#allocation8]  }
  0x29   :  { %55 = vst.msk [vmem:[#allocation2 + $0x10] sm:$0xff] %vm52_vm0, %v579_v0  ;;  %56 = vst.msk [vmem:[#allocation2 + $0x18] sm:$0xff] %vm52_vm0, %v579_v0  ;;  %421 = vmatprep.mubr.msk.bf16.mxu0 %vm580_vm1, %v579_v0  ;;  %429 = vmatprep.mubr.msk.bf16.mxu1 %vm580_vm1, %v579_v0  ;;  %v453_v4 = vld [vmem:[#allocation3] sm:$0xff]   ;;  %v454_v6 = vld [vmem:[#allocation6 + $0x20] sm:$0xff]   ;;  %s337_s22 = sshll.u32 %s581_s21, 4  ;;  %s582_s23 = smov [#allocation9]   ;;  %s338_s22 = int_to_ptr.vmem [resolvable:$true] %s337_s22 }
  0x2a   :  { %57 = vst.msk [vmem:[#allocation2 + $0x20] sm:$0xff] %vm52_vm0, %v579_v0  ;;  %58 = vst.msk [vmem:[#allocation2 + $0x28] sm:$0xff] %vm52_vm0, %v579_v0  ;;  %418 = vmatpush3.bf16.msra.mxu0 %v450_v1  ;;  %426 = vmatpush3.bf16.msra.mxu1 %v452_v3  ;;  %v455_v5 = vld [vmem:[#allocation6 + $0x18] sm:$0xff]   ;;  %v456_v7 = vld [vmem:[#allocation6 + $0x28] sm:$0xff]   ;;  %s349_s24 = sshll.u32 %s582_s23, 4  ;;  %s501_s27 = scalar_lea.vmem %s338_s22, 128  ;;  %s673_s24 = int_to_ptr.vmem [resolvable:$true] %s349_s24 }
  0x2b   :  { %419 = vmatprep.subr.bf16.mxu0 %v579_v0  ;;  %427 = vmatprep.subr.bf16.mxu1 %v579_v0  ;;  %v391_v27 = vld [vmem:[%s731_s2] ss:$0 sm:$0xff]  ;;  %v395_v31 = vld [vmem:[%s731_s2 + $0x1] ss:$0 sm:$0xff]  ;;  %v399_v45 = vld [vmem:[%s731_s2 + $0x2] ss:$0 sm:$0xff]  ;;  %p502_p2 = scmp.ne.s32.totalorder %s338_s22, %s501_s27  ;;  %p506_p3 = scmp.lt.s32.totalorder %s338_s22, %s338_s22 }
  0x2c   :  { %p507_p4 = scmp.lt.s32.totalorder %s501_s27, %s501_s27 }
  0x2e   :  { %420 = vmatpush3.bf16.msra.mxu0 %v451_v2  ;;  %428 = vmatpush3.bf16.msra.mxu1 %v455_v5  ;;  %p508_p5 = por %p507_p4, %p506_p3 }
  0x2f   :  { %433 = vmatprep.subr.bf16.mxu0 %v579_v0  ;;  %v61_v8 = vld [vmem:[#allocation2] sm:$0xff]  ;;  %v62_v10 = vld [vmem:[#allocation2 + $0x8] sm:$0xff] }
  0x30   :  { %v134_v11 = vld [vmem:[#allocation2 + $0x10] sm:$0xff]  ;;  %v135_v16 = vld [vmem:[#allocation2 + $0x18] sm:$0xff]  ;;  %p509_p6 = pnand %p508_p5, %p502_p2 }
  0x31   :  { %422 = vmatmul.mubr.msk.bf16.vlgmr.msra.gmra.mrb[0].mxu0 %vm52_vm0, %v453_v4  ;;  %430 = vmatmul.mubr.msk.bf16.vlgmr.msra.gmra.mrb[0].mxu1 %vm52_vm0, %v453_v4  ;;  %v199_v24 = vld [vmem:[#allocation2 + $0x20] sm:$0xff]  ;;  %v200_v26 = vld [vmem:[#allocation2 + $0x28] sm:$0xff] }
  0x32   :  { %434 = vmatpush3.bf16.msra.mxu0 %v454_v6  ;;  %437 = vmatprep.mubr.msk.bf16.mxu0 %vm580_vm1, %v579_v0 }
  0x33   :  { %435 = vmatprep.subr.bf16.mxu0 %v579_v0 }
  0x36   :  { %436 = vmatpush3.bf16.msra.mxu0 %v456_v7 }
  0x39   :  { %438 = vmatmul.mubr.msk.bf16.vlgmr.msra.gmra.mrb[4].mxu0 %vm52_vm0, %v453_v4 }
 0x104   :  { %v122_v9 = vpop.f32.mrb[0].mxu0  ;;  %v187_v15 = vpop.f32.mrb[0].mxu1 }
 0x105   :  { %v129_v12 = vadd.f32 %v122_v9, %v61_v8  ;;  %v423_v13 = vpop.f32.mrb[1].mxu0  ;;  %v194_v19 = vadd.f32 %v187_v15, %v134_v11  ;;  %v431_v20 = vpop.f32.mrb[1].mxu1 }
 0x106   :  { %v125_v14 = vpop.f32.mrb[2].mxu0  ;;  %v190_v21 = vpop.f32.mrb[2].mxu1 }
 0x107   :  { %131 = vst.msk [vmem:[#allocation2] sm:$0xff] %vm52_vm0, %v129_v12  ;;  %v130_v17 = vadd.f32 %v125_v14, %v62_v10  ;;  %v424_v18 = vpop.f32.mrb[3].mxu0  ;;  %196 = vst.msk [vmem:[#allocation2 + $0x10] sm:$0xff] %vm52_vm0, %v194_v19  ;;  %v195_v22 = vadd.f32 %v190_v21, %v135_v16  ;;  %v432_v23 = vpop.f32.mrb[3].mxu1 }
 0x109   :  { %132 = vst.msk [vmem:[#allocation2 + $0x8] sm:$0xff] %vm52_vm0, %v130_v17  ;;  %197 = vst.msk [vmem:[#allocation2 + $0x18] sm:$0xff] %vm52_vm0, %v195_v22 }
 0x10c   :  { %v252_v25 = vpop.f32.mrb[4].mxu0 }
 0x10d   :  { %v259_v28 = vadd.f32 %v252_v25, %v199_v24  ;;  %v439_v29 = vpop.f32.mrb[5].mxu0 }
 0x10e   :  { %v255_v30 = vpop.f32.mrb[6].mxu0  ;;  %v266_v32 = vld [vmem:[#allocation2] sm:$0xff]  ;;  %v288_v36 = vld [vmem:[#allocation2 + $0x10] sm:$0xff] }
 0x10f   :  { %261 = vst.msk [vmem:[#allocation2 + $0x20] sm:$0xff] %vm52_vm0, %v259_v28  ;;  %v260_v33 = vadd.f32 %v255_v30, %v200_v26  ;;  %v440_v34 = vpop.f32.mrb[7].mxu0  ;;  %v275_v35 = vadd.f32 %v391_v27, %v266_v32  ;;  %v298_v38 = vadd.f32 %v395_v31, %v288_v36 }
 0x110   :  { %v267_v37 = vld [vmem:[#allocation2 + $0x8] sm:$0xff]  ;;  %v289_v41 = vld [vmem:[#allocation2 + $0x18] sm:$0xff] }
 0x111   :  { %262 = vst.msk [vmem:[#allocation2 + $0x28] sm:$0xff] %vm52_vm0, %v260_v33  ;;  %v276_v39 = vadd.f32 %v391_v27, %v267_v37  ;;  %v402_v40 = vpack.c.bf16 %v275_v35, %v275_v35  ;;  %v299_v42 = vadd.f32 %v395_v31, %v289_v41  ;;  %v404_v43 = vpack.c.bf16 %v298_v38, %v298_v38 }
 0x113   :  { %v403_v44 = vpack.c.bf16 %v276_v39, %v276_v39  ;;  %286 = vst.msk [vmem:[#allocation8] sm:$0xf] %vm285_vm2, %v402_v40  ;;  %v405_v46 = vpack.c.bf16 %v299_v42, %v299_v42  ;;  %308 = vst.msk [vmem:[#allocation9] sm:$0xf] %vm285_vm2, %v404_v43 }
 0x115   :  { %287 = vst.msk [vmem:[#allocation8 + $0x4] sm:$0xf] %vm285_vm2, %v403_v44 }
 0x116   :  { %512 = shalt.err (!%p509_p6)
}
 0x117   :  { %s513_s7 = scalar_lea.hbm %s732_s3, 128 }
 0x118   :  { %p514_p7 = scmp.ne.s32.totalorder %s732_s3, %s513_s7  ;;  %p517_p8 = scmp.lt.u32.totalorder %s513_s7, %s732_s3 }
 0x11a   :  { %p519_p9 = pnand %p517_p8, %p514_p7 }
 0x11c   :  { %522 = shalt.err (!%p519_p9)
}
 0x11d   :  { %343 = dma.vmem_to_hbm [thread:$0]  %s338_s22, 128, %s732_s3, [#allocation5], %s576_s28, %s576_s28, %s577_s29   ;;  %v310_v47 = vld [vmem:[#allocation2 + $0x20] sm:$0xff]  ;;  %309 = vst.msk [vmem:[#allocation9 + $0x4] sm:$0xf] %vm285_vm2, %v405_v46 }
 0x11e   :  { %v320_v48 = vadd.f32 %v399_v45, %v310_v47  ;;  %s583_s13 = smov [#allocation11]   ;;  %s523_s15 = scalar_lea.vmem %s673_s24, 128 }
 0x11f   :  { %s361_s14 = sshll.u32 %s583_s13, 4  ;;  %p524_p10 = scmp.ne.s32.totalorder %s673_s24, %s523_s15  ;;  %s362_s14 = int_to_ptr.vmem [resolvable:$true] %s361_s14 }
 0x120   :  { %p528_p11 = scmp.lt.s32.totalorder %s673_s24, %s673_s24  ;;  %p529_p12 = scmp.lt.s32.totalorder %s523_s15, %s523_s15 }
 0x122   :  { %p530_p13 = por %p529_p12, %p528_p11 }
 0x124   :  { %p531_p0 = pnand %p530_p13, %p524_p10 }
 0x126   :  { %534 = shalt.err (!%p531_p0)
}
 0x127   :  { %s535_s17 = scalar_lea.hbm %s733_s4, 128 }
 0x128   :  { %p536_p1 = scmp.ne.s32.totalorder %s733_s4, %s535_s17  ;;  %p539_p2 = scmp.lt.u32.totalorder %s535_s17, %s733_s4 }
 0x12a   :  { %p541_p3 = pnand %p539_p2, %p536_p1 }
 0x12c   :  { %544 = shalt.err (!%p541_p3)
}
 0x12d   :  { %355 = dma.vmem_to_hbm [thread:$0]  %s673_s24, 128, %s733_s4, [#allocation10], %s576_s28, %s576_s28, %s577_s29   ;;  %v311_v49 = vld [vmem:[#allocation2 + $0x28] sm:$0xff]  ;;  %v406_v51 = vpack.c.bf16 %v320_v48, %v320_v48 }
 0x12e   :  { %v321_v50 = vadd.f32 %v399_v45, %v311_v49  ;;  %s545_s22 = scalar_lea.vmem %s362_s14, 128  ;;  %p550_p5 = scmp.lt.s32.totalorder %s362_s14, %s362_s14 }
 0x12f   :  { %330 = vst.msk [vmem:[#allocation11] sm:$0xf] %vm285_vm2, %v406_v51  ;;  %p546_p4 = scmp.ne.s32.totalorder %s362_s14, %s545_s22  ;;  %p551_p6 = scmp.lt.s32.totalorder %s545_s22, %s545_s22 }
 0x130   :  { %v407_v52 = vpack.c.bf16 %v321_v50, %v321_v50 }
 0x131   :  { %p552_p7 = por %p551_p6, %p550_p5 }
 0x132   :  { %331 = vst.msk [vmem:[#allocation11 + $0x4] sm:$0xf] %vm285_vm2, %v407_v52 }
 0x133   :  { %p553_p8 = pnand %p552_p7, %p546_p4 }
 0x135   :  { %556 = shalt.err (!%p553_p8)
}
 0x136   :  { %s557_s4 = scalar_lea.hbm %s734_s5, 128 }
 0x137   :  { %p558_p9 = scmp.ne.s32.totalorder %s734_s5, %s557_s4  ;;  %p561_p10 = scmp.lt.u32.totalorder %s557_s4, %s734_s5 }
 0x139   :  { %p563_p11 = pnand %p561_p10, %p558_p9 }
 0x13b   :  { %566 = shalt.err (!%p563_p11)
}
 0x13c   :  { %367 = dma.vmem_to_hbm [thread:$0]  %s362_s14, 128, %s734_s5, [#allocation10], %s576_s28, %s576_s28, %s577_s29  }
 0x13d   :  { %571 = dma.done.wait [#allocation5], 128  }
 0x13e   :  { %572 = vsyncadd [#allocation5], 4294967168 }
 0x13f   :  { %573 = dma.done.wait [#allocation10], 256  }
 0x140   :  { %574 = vsyncadd [#allocation10], 4294967040 }
 0x141   :  { %377 = vsyncpa [#allocation4], 1 }
 0x142   :  { %378 = vsyncpa [#allocation7], 1 }
 0x143   :  { %379 = vsyncpa [#allocation5], 1 }
 0x144   :  { %380 = vsyncpa [#allocation10], 1 }

</bundles_post_ra>
